<compile_context>
chip_gen: v5e
topology: v5e:2x2
jax: 0.10.0
libtpu: 0.0.40
codegen_flags: <defaults>
</compile_context>

<pallas_src>
import functools

import jax
import jax.numpy as jnp
from jax.experimental import pallas as pl
from jax.experimental.pallas import tpu as pltpu


def _round_up(x, m):
    return ((x + m - 1) // m) * m


def _cdiv(a, b):
    return (a + b - 1) // b


def mlp_kernel(x_ref,
               w1_ref, b1_ref,
               w2_ref, b2_ref,
               w3_ref, b3_ref,
               w4_ref, b4_ref,
               w5_ref, b5_ref,
               o_ref, *, act_dtype):
    """Fused forward pass of the whole fc_model for one batch tile."""

    def linear(h, w_ref, b_ref):
        # bf16 operands on the MXU (no-op cast when h is already bf16),
        # f32 accumulation, f32 bias add.
        return jnp.dot(h.astype(jnp.bfloat16), w_ref[...],
                       preferred_element_type=jnp.float32) + b_ref[...]

    def sigmoid(y_f32):
        # Single EUP push (tanh) instead of exp + vrcp; the 0.5*/+1.0 land on
        # the VALU, which has ample slack at these layer widths.  act_dtype is
        # bf16 on v6e/v7x (bf16 EUP ~2x rate) and f32 on v5e.
        y = y_f32.astype(act_dtype)
        return 0.5 * (jnp.tanh(0.5 * y) + 1.0)

    h = x_ref[...]
    h = sigmoid(linear(h, w1_ref, b1_ref))
    h = sigmoid(linear(h, w2_ref, b2_ref))
    h = sigmoid(linear(h, w3_ref, b3_ref))
    h = sigmoid(linear(h, w4_ref, b4_ref))
    # TODO(synk): the reference's final nn.Linear(24, out_dim) is
    # shape-incompatible with the preceding 16-wide activation (PyTorch itself
    # would raise a matmul shape error); implemented as Linear(16, out_dim).
    o_ref[...] = linear(h, w5_ref, b5_ref).astype(o_ref.dtype)


@functools.partial(jax.jit, static_argnames=("max_batch_tile",))
def nn_classifier_forward(x, params, *, max_batch_tile=4096):
    """params: flat f32 list [w1, b1, ..., w5, b5] in the layout above."""
    batch, in_features = x.shape
    out_dim = params[-1].shape[-1]
    out_pad = _round_up(out_dim, 128)          # lane-dense output block

    # Chip-dependent knobs (resolved at trace time).
    kind = jax.devices()[0].device_kind.lower()
    has_bf16_eup = ("v6" in kind) or ("v7" in kind)
    num_tc = 2 if "v7" in kind else 1
    act_dtype = jnp.bfloat16 if has_bf16_eup else jnp.float32

    # Batch tiling: pick the tile COUNT first so padding waste is bounded by
    # ~7 rows per tile; on v7x force >=2 tiles (when the batch is big enough)
    # so the "parallel" grid axis shards across both TensorCores.
    min_tiles = num_tc if batch >= 16 * num_tc else 1
    n_tiles = max(_cdiv(batch, max_batch_tile), min_tiles)
    tb = _round_up(_cdiv(batch, n_tiles), 8)
    padded_batch = _round_up(batch, tb)
    if padded_batch != batch:
        x = jnp.pad(x, ((0, padded_batch - batch), (0, 0)))
    grid = (padded_batch // tb,)

    # Kernel-side params: weights in bf16, biases in f32, final layer
    # zero-padded to out_pad lanes.
    kparams = []
    for layer in range(5):
        w = params[2 * layer]
        b = params[2 * layer + 1]
        if layer == 4 and out_pad != out_dim:
            w = jnp.pad(w, ((0, 0), (0, out_pad - out_dim)))
            b = jnp.pad(b, ((0, 0), (0, out_pad - out_dim)))
        kparams.append(w.astype(jnp.bfloat16))
        kparams.append(b.astype(jnp.float32))

    # BlockSpecs: x/out tiled over the batch grid; params resident (const idx).
    in_specs = [pl.BlockSpec((tb, in_features), lambda i: (i, 0))]
    for p in kparams:
        in_specs.append(pl.BlockSpec(p.shape, lambda i: (0, 0)))
    out_specs = pl.BlockSpec((tb, out_pad), lambda i: (i, 0))

    layer_dims = [(in_features, 128), (128, 64), (64, 32), (32, 16),
                  (16, out_pad)]
    flops = 2 * padded_batch * sum(fi * fo for fi, fo in layer_dims)
    transcendentals = padded_batch * (128 + 64 + 32 + 16)
    bytes_accessed = (padded_batch * in_features * x.dtype.itemsize
                      + padded_batch * out_pad * 2          # bf16 writeback
                      + sum(int(p.size) * p.dtype.itemsize for p in kparams))

    # v5e-class chips have a 16 MiB scoped-VMEM default; big tiles need more.
    vmem_limit = (64 * 1024 * 1024
                  if (not has_bf16_eup and tb >= 2048) else None)

    out_full = pl.pallas_call(
        functools.partial(mlp_kernel, act_dtype=act_dtype),
        out_shape=jax.ShapeDtypeStruct((padded_batch, out_pad), jnp.bfloat16),
        grid=grid,
        in_specs=in_specs,
        out_specs=out_specs,
        compiler_params=pltpu.CompilerParams(
            dimension_semantics=("parallel",),
            vmem_limit_bytes=vmem_limit),
        cost_estimate=pl.CostEstimate(
            flops=flops,
            transcendentals=transcendentals,
            bytes_accessed=bytes_accessed),
    )(x, *kparams)

    # Slice off the padded rows/lanes; return f32 to match the module's dtype.
    return out_full[:batch, :out_dim].astype(jnp.float32)


def init_params(key, in_features, out_dim):
    """Deterministic PyTorch-style init: U(-1/sqrt(fan_in), 1/sqrt(fan_in))."""
    # Final layer uses fan_in=16 (see TODO in kernel about the 24-wide bug).
    dims = [(in_features, 128), (128, 64), (64, 32), (32, 16), (16, out_dim)]
    params = []
    for (fan_in, fan_out) in dims:
        key, kw, kb = jax.random.split(key, 3)
        bound = 1.0 / jnp.sqrt(jnp.float32(fan_in))
        w = jax.random.uniform(kw, (fan_in, fan_out), jnp.float32, -bound, bound)
        b = jax.random.uniform(kb, (1, fan_out), jnp.float32, -bound, bound)
        params += [w, b]
    return params


def reference_forward(x, params):
    """Plain-JAX f32 reference for a sanity check."""
    h = x
    for i in range(0, 8, 2):
        h = jax.nn.sigmoid(h @ params[i] + params[i + 1])
    return h @ params[8] + params[9]


if __name__ == "__main__":
    batch = 8
    in_features = 32
    out_dim = 10

    key = jax.random.PRNGKey(0)
    key, kx = jax.random.split(key)
    x = jax.random.normal(kx, (batch, in_features), jnp.float32)
    params = init_params(key, in_features, out_dim)

    out = nn_classifier_forward(x, params)
    out = jax.block_until_ready(out)

    ref = reference_forward(x, params)
    assert out.shape == (batch, out_dim)
    # bf16 matmul operands / activations / output store => loose tolerance
    # vs the f32 reference.
    assert jnp.allclose(out, ref, atol=7.5e-2, rtol=5e-2), (
        float(jnp.max(jnp.abs(out - ref))))

    print("KERNEL_OK")
</pallas_src>

<mosaic_0001>
module attributes {stable_mosaic.version = 11 : i64} {
  func.func @mlp_kernel(%arg0: i32, %arg1: memref<8x32xf32, #tpu.memory_space<vmem>>, %arg2: memref<32x128xbf16, #tpu.memory_space<vmem>>, %arg3: memref<1x128xf32, #tpu.memory_space<vmem>>, %arg4: memref<128x64xbf16, #tpu.memory_space<vmem>>, %arg5: memref<1x64xf32, #tpu.memory_space<vmem>>, %arg6: memref<64x32xbf16, #tpu.memory_space<vmem>>, %arg7: memref<1x32xf32, #tpu.memory_space<vmem>>, %arg8: memref<32x16xbf16, #tpu.memory_space<vmem>>, %arg9: memref<1x16xf32, #tpu.memory_space<vmem>>, %arg10: memref<16x128xbf16, #tpu.memory_space<vmem>>, %arg11: memref<1x128xf32, #tpu.memory_space<vmem>>, %arg12: memref<8x128xbf16, #tpu.memory_space<vmem>>) attributes {dimension_semantics = [#tpu.dimension_semantics<parallel>], iteration_bounds = array<i64: 1>, scalar_prefetch = 0 : i64, scratch_operands = 0 : i64, tpu.core_type = #tpu.core_type<tc>, window_params = [{transform_indices = @transform_0, window_bounds = array<i64: 8, 32>}, {pipeline_mode = #tpu.pipeline_mode<synchronous>, transform_indices = @transform_1, window_bounds = array<i64: 32, 128>}, {pipeline_mode = #tpu.pipeline_mode<synchronous>, transform_indices = @transform_2, window_bounds = array<i64: 1, 128>}, {pipeline_mode = #tpu.pipeline_mode<synchronous>, transform_indices = @transform_3, window_bounds = array<i64: 128, 64>}, {pipeline_mode = #tpu.pipeline_mode<synchronous>, transform_indices = @transform_4, window_bounds = array<i64: 1, 64>}, {pipeline_mode = #tpu.pipeline_mode<synchronous>, transform_indices = @transform_5, window_bounds = array<i64: 64, 32>}, {pipeline_mode = #tpu.pipeline_mode<synchronous>, transform_indices = @transform_6, window_bounds = array<i64: 1, 32>}, {pipeline_mode = #tpu.pipeline_mode<synchronous>, transform_indices = @transform_7, window_bounds = array<i64: 32, 16>}, {pipeline_mode = #tpu.pipeline_mode<synchronous>, transform_indices = @transform_8, window_bounds = array<i64: 1, 16>}, {pipeline_mode = #tpu.pipeline_mode<synchronous>, transform_indices = @transform_9, window_bounds = array<i64: 16, 128>}, {pipeline_mode = #tpu.pipeline_mode<synchronous>, transform_indices = @transform_10, window_bounds = array<i64: 1, 128>}, {transform_indices = @transform_11, window_bounds = array<i64: 8, 128>}]} {
    %c0 = arith.constant 0 : index
    %c0_0 = arith.constant 0 : index
    %0 = vector.load %arg1[%c0, %c0_0] : memref<8x32xf32, #tpu.memory_space<vmem>>, vector<8x32xf32>
    %1 = arith.truncf %0 : vector<8x32xf32> to vector<8x32xbf16>
    %c0_1 = arith.constant 0 : index
    %c0_2 = arith.constant 0 : index
    %2 = vector.load %arg2[%c0_1, %c0_2] : memref<32x128xbf16, #tpu.memory_space<vmem>>, vector<32x128xbf16>
    %cst = arith.constant dense<0.000000e+00> : vector<8x128xf32>
    %3 = tpu.matmul %1, %2, %cst {dimension_numbers = #tpu.dot_dimension_numbers<[1], [0], [0], [1], [0, 0, 1, 1], [], []>} : vector<8x32xbf16>, vector<32x128xbf16>, vector<8x128xf32> -> vector<8x128xf32>
    %c0_3 = arith.constant 0 : index
    %c0_4 = arith.constant 0 : index
    %4 = vector.load %arg3[%c0_3, %c0_4] : memref<1x128xf32, #tpu.memory_space<vmem>>, vector<1x128xf32>
    %5 = vector.broadcast %4 : vector<1x128xf32> to vector<8x128xf32>
    %6 = arith.addf %3, %5 : vector<8x128xf32>
    %cst_5 = arith.constant 5.000000e-01 : f32
    %7 = vector.broadcast %cst_5 : f32 to vector<8x128xf32>
    %8 = arith.mulf %7, %6 : vector<8x128xf32>
    %9 = math.tanh %8 : vector<8x128xf32>
    %cst_6 = arith.constant 1.000000e+00 : f32
    %10 = vector.broadcast %cst_6 : f32 to vector<8x128xf32>
    %11 = arith.addf %9, %10 : vector<8x128xf32>
    %cst_7 = arith.constant 5.000000e-01 : f32
    %12 = vector.broadcast %cst_7 : f32 to vector<8x128xf32>
    %13 = arith.mulf %12, %11 : vector<8x128xf32>
    %14 = arith.truncf %13 : vector<8x128xf32> to vector<8x128xbf16>
    %c0_8 = arith.constant 0 : index
    %c0_9 = arith.constant 0 : index
    %15 = vector.load %arg4[%c0_8, %c0_9] : memref<128x64xbf16, #tpu.memory_space<vmem>>, vector<128x64xbf16>
    %cst_10 = arith.constant dense<0.000000e+00> : vector<8x64xf32>
    %16 = tpu.matmul %14, %15, %cst_10 {dimension_numbers = #tpu.dot_dimension_numbers<[1], [0], [0], [1], [0, 0, 1, 1], [], []>} : vector<8x128xbf16>, vector<128x64xbf16>, vector<8x64xf32> -> vector<8x64xf32>
    %c0_11 = arith.constant 0 : index
    %c0_12 = arith.constant 0 : index
    %17 = vector.load %arg5[%c0_11, %c0_12] : memref<1x64xf32, #tpu.memory_space<vmem>>, vector<1x64xf32>
    %18 = vector.broadcast %17 : vector<1x64xf32> to vector<8x64xf32>
    %19 = arith.addf %16, %18 : vector<8x64xf32>
    %cst_13 = arith.constant 5.000000e-01 : f32
    %20 = vector.broadcast %cst_13 : f32 to vector<8x64xf32>
    %21 = arith.mulf %20, %19 : vector<8x64xf32>
    %22 = math.tanh %21 : vector<8x64xf32>
    %cst_14 = arith.constant 1.000000e+00 : f32
    %23 = vector.broadcast %cst_14 : f32 to vector<8x64xf32>
    %24 = arith.addf %22, %23 : vector<8x64xf32>
    %cst_15 = arith.constant 5.000000e-01 : f32
    %25 = vector.broadcast %cst_15 : f32 to vector<8x64xf32>
    %26 = arith.mulf %25, %24 : vector<8x64xf32>
    %27 = arith.truncf %26 : vector<8x64xf32> to vector<8x64xbf16>
    %c0_16 = arith.constant 0 : index
    %c0_17 = arith.constant 0 : index
    %28 = vector.load %arg6[%c0_16, %c0_17] : memref<64x32xbf16, #tpu.memory_space<vmem>>, vector<64x32xbf16>
    %cst_18 = arith.constant dense<0.000000e+00> : vector<8x32xf32>
    %29 = tpu.matmul %27, %28, %cst_18 {dimension_numbers = #tpu.dot_dimension_numbers<[1], [0], [0], [1], [0, 0, 1, 1], [], []>} : vector<8x64xbf16>, vector<64x32xbf16>, vector<8x32xf32> -> vector<8x32xf32>
    %c0_19 = arith.constant 0 : index
    %c0_20 = arith.constant 0 : index
    %30 = vector.load %arg7[%c0_19, %c0_20] : memref<1x32xf32, #tpu.memory_space<vmem>>, vector<1x32xf32>
    %31 = vector.broadcast %30 : vector<1x32xf32> to vector<8x32xf32>
    %32 = arith.addf %29, %31 : vector<8x32xf32>
    %cst_21 = arith.constant 5.000000e-01 : f32
    %33 = vector.broadcast %cst_21 : f32 to vector<8x32xf32>
    %34 = arith.mulf %33, %32 : vector<8x32xf32>
    %35 = math.tanh %34 : vector<8x32xf32>
    %cst_22 = arith.constant 1.000000e+00 : f32
    %36 = vector.broadcast %cst_22 : f32 to vector<8x32xf32>
    %37 = arith.addf %35, %36 : vector<8x32xf32>
    %cst_23 = arith.constant 5.000000e-01 : f32
    %38 = vector.broadcast %cst_23 : f32 to vector<8x32xf32>
    %39 = arith.mulf %38, %37 : vector<8x32xf32>
    %40 = arith.truncf %39 : vector<8x32xf32> to vector<8x32xbf16>
    %c0_24 = arith.constant 0 : index
    %c0_25 = arith.constant 0 : index
    %41 = vector.load %arg8[%c0_24, %c0_25] : memref<32x16xbf16, #tpu.memory_space<vmem>>, vector<32x16xbf16>
    %cst_26 = arith.constant dense<0.000000e+00> : vector<8x16xf32>
    %42 = tpu.matmul %40, %41, %cst_26 {dimension_numbers = #tpu.dot_dimension_numbers<[1], [0], [0], [1], [0, 0, 1, 1], [], []>} : vector<8x32xbf16>, vector<32x16xbf16>, vector<8x16xf32> -> vector<8x16xf32>
    %c0_27 = arith.constant 0 : index
    %c0_28 = arith.constant 0 : index
    %43 = vector.load %arg9[%c0_27, %c0_28] : memref<1x16xf32, #tpu.memory_space<vmem>>, vector<1x16xf32>
    %44 = vector.broadcast %43 : vector<1x16xf32> to vector<8x16xf32>
    %45 = arith.addf %42, %44 : vector<8x16xf32>
    %cst_29 = arith.constant 5.000000e-01 : f32
    %46 = vector.broadcast %cst_29 : f32 to vector<8x16xf32>
    %47 = arith.mulf %46, %45 : vector<8x16xf32>
    %48 = math.tanh %47 : vector<8x16xf32>
    %cst_30 = arith.constant 1.000000e+00 : f32
    %49 = vector.broadcast %cst_30 : f32 to vector<8x16xf32>
    %50 = arith.addf %48, %49 : vector<8x16xf32>
    %cst_31 = arith.constant 5.000000e-01 : f32
    %51 = vector.broadcast %cst_31 : f32 to vector<8x16xf32>
    %52 = arith.mulf %51, %50 : vector<8x16xf32>
    %53 = arith.truncf %52 : vector<8x16xf32> to vector<8x16xbf16>
    %c0_32 = arith.constant 0 : index
    %c0_33 = arith.constant 0 : index
    %54 = vector.load %arg10[%c0_32, %c0_33] : memref<16x128xbf16, #tpu.memory_space<vmem>>, vector<16x128xbf16>
    %cst_34 = arith.constant dense<0.000000e+00> : vector<8x128xf32>
    %55 = tpu.matmul %53, %54, %cst_34 {dimension_numbers = #tpu.dot_dimension_numbers<[1], [0], [0], [1], [0, 0, 1, 1], [], []>} : vector<8x16xbf16>, vector<16x128xbf16>, vector<8x128xf32> -> vector<8x128xf32>
    %c0_35 = arith.constant 0 : index
    %c0_36 = arith.constant 0 : index
    %56 = vector.load %arg11[%c0_35, %c0_36] : memref<1x128xf32, #tpu.memory_space<vmem>>, vector<1x128xf32>
    %57 = vector.broadcast %56 : vector<1x128xf32> to vector<8x128xf32>
    %58 = arith.addf %55, %57 : vector<8x128xf32>
    %59 = arith.truncf %58 : vector<8x128xf32> to vector<8x128xbf16>
    %c0_37 = arith.constant 0 : index
    %c0_38 = arith.constant 0 : index
    %60 = vector.load %arg12[%c0_37, %c0_38] : memref<8x128xbf16, #tpu.memory_space<vmem>>, vector<8x128xbf16>
    tpu.vector_store %arg12[%c0_37, %c0_38], %59 {strides = array<i32>} : memref<8x128xbf16, #tpu.memory_space<vmem>>, vector<8x128xbf16>,
    return
  }
  func.func @transform_0(%arg0: i32) -> (i32, i32) {
    %c0_i32 = arith.constant 0 : i32
    %c0_i32_0 = arith.constant 0 : i32
    return %arg0, %c0_i32 : i32, i32
  }
  func.func @transform_1(%arg0: i32) -> (i32, i32) {
    %c0_i32 = arith.constant 0 : i32
    %c0_i32_0 = arith.constant 0 : i32
    %c0_i32_1 = arith.constant 0 : i32
    return %c0_i32, %c0_i32_0 : i32, i32
  }
  func.func @transform_2(%arg0: i32) -> (i32, i32) {
    %c0_i32 = arith.constant 0 : i32
    %c0_i32_0 = arith.constant 0 : i32
    %c0_i32_1 = arith.constant 0 : i32
    return %c0_i32, %c0_i32_0 : i32, i32
  }
  func.func @transform_3(%arg0: i32) -> (i32, i32) {
    %c0_i32 = arith.constant 0 : i32
    %c0_i32_0 = arith.constant 0 : i32
    %c0_i32_1 = arith.constant 0 : i32
    return %c0_i32, %c0_i32_0 : i32, i32
  }
  func.func @transform_4(%arg0: i32) -> (i32, i32) {
    %c0_i32 = arith.constant 0 : i32
    %c0_i32_0 = arith.constant 0 : i32
    %c0_i32_1 = arith.constant 0 : i32
    return %c0_i32, %c0_i32_0 : i32, i32
  }
  func.func @transform_5(%arg0: i32) -> (i32, i32) {
    %c0_i32 = arith.constant 0 : i32
    %c0_i32_0 = arith.constant 0 : i32
    %c0_i32_1 = arith.constant 0 : i32
    return %c0_i32, %c0_i32_0 : i32, i32
  }
  func.func @transform_6(%arg0: i32) -> (i32, i32) {
    %c0_i32 = arith.constant 0 : i32
    %c0_i32_0 = arith.constant 0 : i32
    %c0_i32_1 = arith.constant 0 : i32
    return %c0_i32, %c0_i32_0 : i32, i32
  }
  func.func @transform_7(%arg0: i32) -> (i32, i32) {
    %c0_i32 = arith.constant 0 : i32
    %c0_i32_0 = arith.constant 0 : i32
    %c0_i32_1 = arith.constant 0 : i32
    return %c0_i32, %c0_i32_0 : i32, i32
  }
  func.func @transform_8(%arg0: i32) -> (i32, i32) {
    %c0_i32 = arith.constant 0 : i32
    %c0_i32_0 = arith.constant 0 : i32
    %c0_i32_1 = arith.constant 0 : i32
    return %c0_i32, %c0_i32_0 : i32, i32
  }
  func.func @transform_9(%arg0: i32) -> (i32, i32) {
    %c0_i32 = arith.constant 0 : i32
    %c0_i32_0 = arith.constant 0 : i32
    %c0_i32_1 = arith.constant 0 : i32
    return %c0_i32, %c0_i32_0 : i32, i32
  }
  func.func @transform_10(%arg0: i32) -> (i32, i32) {
    %c0_i32 = arith.constant 0 : i32
    %c0_i32_0 = arith.constant 0 : i32
    %c0_i32_1 = arith.constant 0 : i32
    return %c0_i32, %c0_i32_0 : i32, i32
  }
  func.func @transform_11(%arg0: i32) -> (i32, i32) {
    %c0_i32 = arith.constant 0 : i32
    %c0_i32_0 = arith.constant 0 : i32
    return %arg0, %c0_i32 : i32, i32
  }
}

</mosaic_0001>

<bundles_post_ra>
// kernel: nn_classifier_forward.1
= control target key start
LH: loop header
LB: loop body
LE: loop exit
PB: predicated region body
PF: predicated region fallthrough
CT: control target
= control target key end

     0   :  { %vm61_vm0 = vcmask 261120   ;;  %vm205_vm1 = vcmask 523264   ;;  %vm280_vm2 = vcmask 130048   ;;  %s539_s1 = inlined_call_operand.vmem [shape: bf16[32,128], index: 1, kind: input, shape index: {}]   ;;  %s540_s0 = inlined_call_operand.vmem [shape: f32[8,32], index: 0, kind: input, shape index: {}]   ;;  %s541_s3 = inlined_call_operand.vmem [shape: bf16[128,64], index: 3, kind: input, shape index: {}]   ;;  %s542_s2 = inlined_call_operand.vmem [shape: f32[1,128], index: 2, kind: input, shape index: {}]   ;;  %s543_s4 = inlined_call_operand.vmem [shape: f32[1,64], index: 4, kind: input, shape index: {}]   ;;  %s544_s6 = inlined_call_operand.vmem [shape: f32[1,32], index: 6, kind: input, shape index: {}]   ;;  %s545_s5 = inlined_call_operand.vmem [shape: bf16[64,32], index: 5, kind: input, shape index: {}]   ;;  %s546_s8 = inlined_call_operand.vmem [shape: f32[1,16], index: 8, kind: input, shape index: {}]   ;;  %s547_s7 = inlined_call_operand.vmem [shape: bf16[32,16], index: 7, kind: input, shape index: {}]   ;;  %s548_s10 = inlined_call_operand.vmem [shape: f32[1,128], index: 10, kind: input, shape index: {}]   ;;  %s549_s9 = inlined_call_operand.vmem [shape: bf16[16,128], index: 9, kind: input, shape index: {}]   ;;  %s550_s11 = inlined_call_operand.vmem [shape: bf16[8,128], index: 11, kind: output, shape index: {}]  }
   0x1   :  { %v376_v0 = vld [vmem:[%s539_s1 + $0x8] sm:$0xff]  ;;  %v384_v1 = vld [vmem:[%s541_s3 + $0x38] sm:$0xff]  ;;  %v375_v2 = vld [vmem:[%s539_s1] sm:$0xff] }
   0x2   :  { %71 = vmatpush.bf16.msra.mxu0 %v376_v0  ;;  %v39_v3 = vld [vmem:[%s540_s0] sm:$0xff]  ;;  %151 = vmatpush.bf16.msra.mxu1 %v384_v1  ;;  %v383_v4 = vld [vmem:[%s541_s3 + $0x30] sm:$0xff]  ;;  %v382_v6 = vld [vmem:[%s541_s3 + $0x28] sm:$0xff] }
   0x3   :  { %v40_v5 = vpack.c.bf16 %v39_v3, %v39_v3  ;;  %v381_v7 = vld [vmem:[%s541_s3 + $0x20] sm:$0xff]  ;;  %v380_v8 = vld [vmem:[%s541_s3 + $0x18] sm:$0xff]  ;;  %v379_v9 = vld [vmem:[%s541_s3 + $0x10] sm:$0xff] }
   0x4   :  { %v378_v10 = vld [vmem:[%s541_s3 + $0x8] sm:$0xff]  ;;  %v377_v11 = vld [vmem:[%s541_s3] sm:$0xff]  ;;  %v388_v21 = vld [vmem:[%s545_s5 + $0x18] sm:$0xff] }
   0x5   :  { %v392_v12 = vld [vmem:[%s542_s2] ss:$0 sm:$0xff]  ;;  %213 = vmatpush.bf16.msra.mxu2 %v388_v21  ;;  %v387_v22 = vld [vmem:[%s545_s5 + $0x10] sm:$0xff]  ;;  %v386_v23 = vld [vmem:[%s545_s5 + $0x8] sm:$0xff] }
   0x6   :  { %72 = vmatpush.bf16.msra.mxu0 %v375_v2  ;;  %152 = vmatpush.bf16.msra.mxu1 %v383_v4  ;;  %v385_v24 = vld [vmem:[%s545_s5] sm:$0xff]  ;;  %v390_v34 = vld [vmem:[%s547_s7 + $0x8] sm:$0xff] }
   0x7   :  { %v393_v25 = vld [vmem:[%s543_s4] ss:$0 sm:$0xff]  ;;  %256 = vmatpush.bf16.msra.mxu3 %v390_v34 }
   0x8   :  { %v389_v35 = vld [vmem:[%s547_s7] sm:$0xff] }
   0x9   :  { %311 = vmatmul.msk.bf16.vlgmr.msra.gmra.mxu0 %vm61_vm0, %v40_v5  ;;  %214 = vmatpush.bf16.msra.mxu2 %v387_v22  ;;  %v394_v36 = vld [vmem:[%s544_s6] ss:$0 sm:$0xff] }
   0xa   :  { %153 = vmatpush.bf16.msra.mxu1 %v382_v6  ;;  %v391_v45 = vld [vmem:[%s549_s9] sm:$0xff] }
   0xb   :  { %257 = vmatpush.bf16.msra.mxu3 %v389_v35  ;;  %291 = vmatpush.bf16.msrb.mxu0 %v391_v45  ;;  %v395_v46 = vld [vmem:[%s546_s8] ss:$0 sm:$0xff] }
   0xc   :  { %v396_v55 = vld [vmem:[%s548_s10] ss:$0 sm:$0xff] }
   0xd   :  { %215 = vmatpush.bf16.msra.mxu2 %v386_v23 }
   0xe   :  { %154 = vmatpush.bf16.msra.mxu1 %v381_v7 }
  0x11   :  { %216 = vmatpush.bf16.msra.mxu2 %v385_v24 }
  0x12   :  { %155 = vmatpush.bf16.msra.mxu1 %v380_v8 }
  0x16   :  { %156 = vmatpush.bf16.msra.mxu1 %v379_v9 }
  0x1a   :  { %157 = vmatpush.bf16.msra.mxu1 %v378_v10 }
  0x1e   :  { %158 = vmatpush.bf16.msra.mxu1 %v377_v11 }
  0x86   :  { %v74_v13 = vpop.f32.mrf.mxu0 }
  0x87   :  { %v75_v14 = vadd.f32 %v392_v12, %v74_v13 }
  0x89   :  { %v78_v15 = vmul.f32 0.5, %v75_v14 }
  0x8b   :  { %397 = vtanh.f32 %v78_v15 }
  0x8e   :  { %v76_v16 = vpop.f32.mrf.mxu0 }
  0x91   :  { %v398_v17 = vpop.eup %397 }
  0x92   :  { %v80_v18 = vadd.f32 1.0, %v398_v17 }
  0x94   :  { %v81_v19 = vmul.f32 0.5, %v80_v18 }
  0x96   :  { %v82_v20 = vpack.c.bf16 %v81_v19, %v81_v19 }
  0x98   :  { %159 = vmatmul.bf16.vlgmr.msra.gmra.mxu1 %v82_v20 }
 0x115   :  { %v160_v26 = vpop.f32.mrf.mxu1 }
 0x116   :  { %v161_v27 = vadd.f32 %v393_v25, %v160_v26 }
 0x118   :  { %v164_v28 = vmul.f32 0.5, %v161_v27 }
 0x11a   :  { %399 = vtanh.f32 %v164_v28 }
 0x11d   :  { %v162_v29 = vpop.f32.mrf.mxu1 }
 0x120   :  { %v400_v30 = vpop.eup %399 }
 0x121   :  { %v166_v31 = vadd.f32 1.0, %v400_v30 }
 0x123   :  { %v167_v32 = vmul.f32 0.5, %v166_v31 }
 0x125   :  { %v168_v33 = vpack.c.bf16 %v167_v32, %v167_v32 }
 0x127   :  { %360 = vmatmul.msk.bf16.vlgmr.msra.gmra.mxu2 %vm205_vm1, %v168_v33 }
 0x1aa   :  { %v218_v37 = vpop.f32.mrf.mxu2 }
 0x1ab   :  { %v219_v38 = vadd.f32 %v394_v36, %v218_v37 }
 0x1ad   :  { %v222_v39 = vmul.f32 0.5, %v219_v38 }
 0x1af   :  { %401 = vtanh.f32 %v222_v39 }
 0x1b2   :  { %v220_v40 = vpop.f32.mrf.mxu2 }
 0x1b5   :  { %v402_v41 = vpop.eup %401 }
 0x1b6   :  { %v224_v42 = vadd.f32 1.0, %v402_v41 }
 0x1b8   :  { %v225_v43 = vmul.f32 0.5, %v224_v42 }
 0x1ba   :  { %v226_v44 = vpack.c.bf16 %v225_v43, %v225_v43 }
 0x1bc   :  { %369 = vmatmul.msk.bf16.vlgmr.msra.gmra.mxu3 %vm61_vm0, %v226_v44 }
 0x23f   :  { %v259_v47 = vpop.f32.mrf.mxu3 }
 0x240   :  { %v260_v48 = vadd.f32 %v395_v46, %v259_v47 }
 0x242   :  { %v263_v49 = vmul.f32 0.5, %v260_v48 }
 0x244   :  { %403 = vtanh.f32 %v263_v49 }
 0x247   :  { %v261_v50 = vpop.f32.mrf.mxu3 }
 0x24a   :  { %v404_v51 = vpop.eup %403 }
 0x24b   :  { %v265_v52 = vadd.f32 1.0, %v404_v51 }
 0x24d   :  { %v266_v53 = vmul.f32 0.5, %v265_v52 }
 0x24f   :  { %v267_v54 = vpack.c.bf16 %v266_v53, %v266_v53 }
 0x251   :  { %374 = vmatmul.msk.bf16.vlgmr.msrb.gmra.mxu0 %vm280_vm2, %v267_v54 }
 0x2ce   :  { %v293_v56 = vpop.f32.mrf.mxu0 }
 0x2cf   :  { %v294_v57 = vadd.f32 %v396_v55, %v293_v56 }
 0x2d1   :  { %v297_v58 = vpack.c.bf16 %v294_v57, %v294_v57 }
 0x2d3   :  { %298 = vst [vmem:[%s550_s11] sm:$0xf] %v297_v58 }
 0x2d6   :  { %v295_v59 = vpop.f32.mrf.mxu0 }

</bundles_post_ra>
